<compile_context>
chip_gen: v7x
topology: tpu7x:2x2x1
jax: 0.10.0
libtpu: 0.0.40
codegen_flags: <defaults>
</compile_context>

<pallas_src>
import jax
import jax.numpy as jnp
from jax.experimental import pallas as pl
from jax.experimental.pallas import tpu as pltpu

BOARD_SIZE = 8
ACTION_DIM = BOARD_SIZE ** 2          # 64
EMBED_DIM = 128                       # cjepa_model.embed_dim
NEG_SLOPE = 0.01                      # nn.LeakyReLU default
MAX_TILE_B = 512                      # amortize ~0.35 us/step; <2 MiB VMEM at
                                      # feat=256 even on v7x's 32 MiB scoped default


def _round_up(x, m):
    return ((x + m - 1) // m) * m


def _muzero_dynamics_kernel(x_ref, act_ref,
                            wenc_ref, w1b_ref, w1a_ref, w2_ref, bias_ref,
                            next_ref, rew_ref):
    # Packed resident constants: row0=b_enc, row1=b1, row2=b2, row3=wr, [4,0]=br.
    biases = bias_ref[...]
    b_enc = biases[0:1, :]
    b1 = biases[1:2, :]
    b2 = biases[2:3, :]
    wr = biases[3:4, :]
    br = biases[4:5, 0:1]

    # TODO(synk): the real cjepa.ijepa.context_encoder is an external ViT; a
    # single linear projection is used as a deterministic stand-in here.
    emb = (jnp.dot(x_ref[...].astype(jnp.bfloat16),
                   wenc_ref[...].astype(jnp.bfloat16),
                   preferred_element_type=jnp.float32) + b_enc)

    # one_hot(action) @ W1b rebuilt in-kernel (iota compare + tiny MXU dot) —
    # no wrapper gather, no extra (B, E) HBM input stream.
    tile_b = act_ref.shape[0]
    onehot = (jax.lax.broadcasted_iota(jnp.int32, (tile_b, ACTION_DIM), 1)
              == act_ref[...]).astype(jnp.bfloat16)
    arow = jnp.dot(onehot, w1b_ref[...].astype(jnp.bfloat16),
                   preferred_element_type=jnp.float32)

    # dynamics Linear #1 on concat([emb, one_hot(action)]) folded as
    # emb @ W1a + one_hot @ W1b; LeakyReLU in f32 on the VPU.
    h1 = (jnp.dot(emb.astype(jnp.bfloat16), w1a_ref[...].astype(jnp.bfloat16),
                  preferred_element_type=jnp.float32) + arow + b1)
    h1 = jnp.where(h1 > 0, h1, NEG_SLOPE * h1)

    # dynamics Linear #2 -> next_state_embedding (f32 output).
    h2 = (jnp.dot(h1.astype(jnp.bfloat16), w2_ref[...].astype(jnp.bfloat16),
                  preferred_element_type=jnp.float32) + b2)
    next_ref[...] = h2

    # reward head Linear(E, 1): f32 VPU multiply + lane reduction, stored as a
    # (tile_b, 1) column — 4 B/row of writeback, no broadcast, no relayout.
    rew_ref[...] = jnp.sum(h2 * wr, axis=-1, keepdims=True) + br


def init_params(key, state_feat_dim):
    ks = jax.random.split(key, 8)
    s = 0.05
    return {
        "w_enc": s * jax.random.normal(ks[0], (state_feat_dim, EMBED_DIM), jnp.float32),
        "b_enc": s * jax.random.normal(ks[1], (1, EMBED_DIM), jnp.float32),
        "w1a":   s * jax.random.normal(ks[2], (EMBED_DIM, EMBED_DIM), jnp.float32),
        "w1b":   s * jax.random.normal(ks[3], (ACTION_DIM, EMBED_DIM), jnp.float32),
        "b1":    s * jax.random.normal(ks[4], (1, EMBED_DIM), jnp.float32),
        "w2":    s * jax.random.normal(ks[5], (EMBED_DIM, EMBED_DIM), jnp.float32),
        "b2":    s * jax.random.normal(ks[6], (1, EMBED_DIM), jnp.float32),
        "wr":    s * jax.random.normal(ks[7], (EMBED_DIM, 1), jnp.float32),
        "br":    jnp.zeros((1, 1), jnp.float32),
    }


@jax.jit
def muzero_dynamics_forward(state, action, params):
    B = state.shape[0]
    feat = state.shape[1] * state.shape[2] * state.shape[3]
    x = state.reshape(B, feat).astype(jnp.float32)          # no wrapper bf16 cast
    act = action.astype(jnp.int32).reshape(B, 1)

    # Batch tiling: as large as possible (HBM-roofline / per-step amortization).
    tile_b = min(MAX_TILE_B, _round_up(B, 8))
    # v7x megacore: give mid-sized batches >= 2 tiles so the "parallel" batch
    # axis can be split across both TensorCores (no effect on v5e/v6e 1-TC).
    if 64 <= B <= MAX_TILE_B:
        tile_b = _round_up((B + 1) // 2, 8)
    b_pad = _round_up(B, tile_b)
    if b_pad != B:
        x = jnp.pad(x, ((0, b_pad - B), (0, 0)))
        act = jnp.pad(act, ((0, b_pad - B), (0, 0)))         # action 0 is valid

    # Pack the five tiny bias/scalar tensors into one resident (8, E) f32 block.
    bias_block = jnp.concatenate(
        [params["b_enc"], params["b1"], params["b2"], params["wr"].T,
         jnp.pad(params["br"], ((0, 0), (0, EMBED_DIM - 1))),
         jnp.zeros((3, EMBED_DIM), jnp.float32)], axis=0)     # (8, EMBED_DIM)

    grid = (b_pad // tile_b,)

    def batch_spec(cols):
        return pl.BlockSpec((tile_b, cols), lambda i: (i, 0))

    def resident(rows, cols):
        return pl.BlockSpec((rows, cols), lambda i: (0, 0))

    flops = 2 * b_pad * EMBED_DIM * (feat + 2 * EMBED_DIM + ACTION_DIM + 1)
    bytes_accessed = (
        b_pad * (feat * 4 + 4)                                   # x (f32) + action
        + (feat + ACTION_DIM + 2 * EMBED_DIM + 8) * EMBED_DIM * 4  # resident weights/bias
        + b_pad * (EMBED_DIM * 4 + 4))                           # outputs (f32)

    next_emb, reward = pl.pallas_call(
        _muzero_dynamics_kernel,
        out_shape=(jax.ShapeDtypeStruct((b_pad, EMBED_DIM), jnp.float32),
                   jax.ShapeDtypeStruct((b_pad, 1), jnp.float32)),
        grid=grid,
        in_specs=[
            batch_spec(feat),                    # x (f32)
            batch_spec(1),                       # action indices (int32)
            resident(feat, EMBED_DIM),           # w_enc (f32, cast in-kernel)
            resident(ACTION_DIM, EMBED_DIM),     # w1b  (f32, cast in-kernel)
            resident(EMBED_DIM, EMBED_DIM),      # w1a  (f32, cast in-kernel)
            resident(EMBED_DIM, EMBED_DIM),      # w2   (f32, cast in-kernel)
            resident(8, EMBED_DIM),              # packed b_enc/b1/b2/wr/br (f32)
        ],
        out_specs=(batch_spec(EMBED_DIM),
                   pl.BlockSpec((tile_b, 1), lambda i: (i, 0))),
        compiler_params=pltpu.CompilerParams(
            dimension_semantics=("parallel",)),
        cost_estimate=pl.CostEstimate(flops=flops, transcendentals=0,
                                      bytes_accessed=bytes_accessed),
    )(x, act, params["w_enc"], params["w1b"], params["w1a"], params["w2"],
      bias_block)

    # Drop batch padding; reward column -> (B,).
    return next_emb[:B], reward[:B, 0]


def _reference_forward(state, action, params):
    """Pure-JAX reference with matching bf16-operand / f32-accum semantics."""
    B = state.shape[0]
    x = state.reshape(B, -1).astype(jnp.float32)
    emb = (jnp.dot(x.astype(jnp.bfloat16), params["w_enc"].astype(jnp.bfloat16),
                   preferred_element_type=jnp.float32) + params["b_enc"])
    arow = params["w1b"][action].astype(jnp.bfloat16).astype(jnp.float32)
    h1 = (jnp.dot(emb.astype(jnp.bfloat16), params["w1a"].astype(jnp.bfloat16),
                  preferred_element_type=jnp.float32) + arow + params["b1"])
    h1 = jnp.where(h1 > 0, h1, NEG_SLOPE * h1)
    h2 = (jnp.dot(h1.astype(jnp.bfloat16), params["w2"].astype(jnp.bfloat16),
                  preferred_element_type=jnp.float32) + params["b2"])
    reward = jnp.sum(h2 * params["wr"][:, 0][None, :], axis=-1) + params["br"][0, 0]
    return h2, reward


if __name__ == "__main__":
    key = jax.random.PRNGKey(0)
    k_state, k_param = jax.random.split(key)

    B, C, H, W = 2, 4, BOARD_SIZE, BOARD_SIZE          # NCHW state
    state = jax.random.normal(k_state, (B, C, H, W), jnp.float32)
    action = jnp.array([3, 17], dtype=jnp.int32)       # indices into 8*8 board

    params = init_params(k_param, C * H * W)

    next_emb, reward = muzero_dynamics_forward(state, action, params)
    jax.block_until_ready((next_emb, reward))

    ref_emb, ref_rew = _reference_forward(state, action, params)
    assert next_emb.shape == (B, EMBED_DIM)
    assert reward.shape == (B,)
    assert jnp.allclose(next_emb, ref_emb, atol=1e-3, rtol=1e-3)
    assert jnp.allclose(reward, ref_rew, atol=1e-3, rtol=1e-3)

    print("KERNEL_OK")
</pallas_src>

<mosaic_0001>
module attributes {stable_mosaic.version = 11 : i64} {
  func.func @_muzero_dynamics_kernel(%arg0: i32, %arg1: memref<8x256xf32, #tpu.memory_space<vmem>>, %arg2: memref<8x1xi32, #tpu.memory_space<vmem>>, %arg3: memref<256x128xf32, #tpu.memory_space<vmem>>, %arg4: memref<64x128xf32, #tpu.memory_space<vmem>>, %arg5: memref<128x128xf32, #tpu.memory_space<vmem>>, %arg6: memref<128x128xf32, #tpu.memory_space<vmem>>, %arg7: memref<8x128xf32, #tpu.memory_space<vmem>>, %arg8: memref<8x128xf32, #tpu.memory_space<vmem>>, %arg9: memref<8x1xf32, #tpu.memory_space<vmem>>) attributes {dimension_semantics = [#tpu.dimension_semantics<parallel>], iteration_bounds = array<i64: 1>, scalar_prefetch = 0 : i64, scratch_operands = 0 : i64, tpu.core_type = #tpu.core_type<tc>, window_params = [{transform_indices = @transform_0, window_bounds = array<i64: 8, 256>}, {transform_indices = @transform_1, window_bounds = array<i64: 8, 1>}, {pipeline_mode = #tpu.pipeline_mode<synchronous>, transform_indices = @transform_2, window_bounds = array<i64: 256, 128>}, {pipeline_mode = #tpu.pipeline_mode<synchronous>, transform_indices = @transform_3, window_bounds = array<i64: 64, 128>}, {pipeline_mode = #tpu.pipeline_mode<synchronous>, transform_indices = @transform_4, window_bounds = array<i64: 128, 128>}, {pipeline_mode = #tpu.pipeline_mode<synchronous>, transform_indices = @transform_5, window_bounds = array<i64: 128, 128>}, {pipeline_mode = #tpu.pipeline_mode<synchronous>, transform_indices = @transform_6, window_bounds = array<i64: 8, 128>}, {transform_indices = @transform_7, window_bounds = array<i64: 8, 128>}, {transform_indices = @transform_8, window_bounds = array<i64: 8, 1>}]} {
    %c0 = arith.constant 0 : index
    %c0_0 = arith.constant 0 : index
    %0 = vector.load %arg7[%c0, %c0_0] : memref<8x128xf32, #tpu.memory_space<vmem>>, vector<8x128xf32>
    %1 = vector.extract_strided_slice %0 {offsets = [0, 0], sizes = [1, 128], strides = [1, 1]} : vector<8x128xf32> to vector<1x128xf32>
    %2 = vector.extract_strided_slice %0 {offsets = [1, 0], sizes = [1, 128], strides = [1, 1]} : vector<8x128xf32> to vector<1x128xf32>
    %3 = vector.extract_strided_slice %0 {offsets = [2, 0], sizes = [1, 128], strides = [1, 1]} : vector<8x128xf32> to vector<1x128xf32>
    %4 = vector.extract_strided_slice %0 {offsets = [3, 0], sizes = [1, 128], strides = [1, 1]} : vector<8x128xf32> to vector<1x128xf32>
    %5 = vector.extract_strided_slice %0 {offsets = [4, 0], sizes = [1, 1], strides = [1, 1]} : vector<8x128xf32> to vector<1x1xf32>
    %c0_1 = arith.constant 0 : index
    %c0_2 = arith.constant 0 : index
    %6 = vector.load %arg1[%c0_1, %c0_2] : memref<8x256xf32, #tpu.memory_space<vmem>>, vector<8x256xf32>
    %7 = arith.truncf %6 : vector<8x256xf32> to vector<8x256xbf16>
    %c0_3 = arith.constant 0 : index
    %c0_4 = arith.constant 0 : index
    %8 = vector.load %arg3[%c0_3, %c0_4] : memref<256x128xf32, #tpu.memory_space<vmem>>, vector<256x128xf32>
    %9 = arith.truncf %8 : vector<256x128xf32> to vector<256x128xbf16>
    %cst = arith.constant dense<0.000000e+00> : vector<8x128xf32>
    %10 = tpu.matmul %7, %9, %cst {dimension_numbers = #tpu.dot_dimension_numbers<[1], [0], [0], [1], [0, 0, 1, 1], [], []>} : vector<8x256xbf16>, vector<256x128xbf16>, vector<8x128xf32> -> vector<8x128xf32>
    %11 = vector.broadcast %1 : vector<1x128xf32> to vector<8x128xf32>
    %12 = arith.addf %10, %11 : vector<8x128xf32>
    %13 = tpu.iota {dimensions = array<i32: 1>} : vector<8x64xi32>
    %c0_5 = arith.constant 0 : index
    %c0_6 = arith.constant 0 : index
    %14 = vector.load %arg2[%c0_5, %c0_6] : memref<8x1xi32, #tpu.memory_space<vmem>>, vector<8x1xi32>
    %15 = vector.broadcast %14 : vector<8x1xi32> to vector<8x64xi32>
    %16 = arith.cmpi eq, %13, %15 : vector<8x64xi32>
    %17 = arith.extui %16 : vector<8x64xi1> to vector<8x64xi32>
    %18 = arith.sitofp %17 : vector<8x64xi32> to vector<8x64xf32>
    %19 = arith.truncf %18 : vector<8x64xf32> to vector<8x64xbf16>
    %c0_7 = arith.constant 0 : index
    %c0_8 = arith.constant 0 : index
    %20 = vector.load %arg4[%c0_7, %c0_8] : memref<64x128xf32, #tpu.memory_space<vmem>>, vector<64x128xf32>
    %21 = arith.truncf %20 : vector<64x128xf32> to vector<64x128xbf16>
    %cst_9 = arith.constant dense<0.000000e+00> : vector<8x128xf32>
    %22 = tpu.matmul %19, %21, %cst_9 {dimension_numbers = #tpu.dot_dimension_numbers<[1], [0], [0], [1], [0, 0, 1, 1], [], []>} : vector<8x64xbf16>, vector<64x128xbf16>, vector<8x128xf32> -> vector<8x128xf32>
    %23 = arith.truncf %12 : vector<8x128xf32> to vector<8x128xbf16>
    %c0_10 = arith.constant 0 : index
    %c0_11 = arith.constant 0 : index
    %24 = vector.load %arg5[%c0_10, %c0_11] : memref<128x128xf32, #tpu.memory_space<vmem>>, vector<128x128xf32>
    %25 = arith.truncf %24 : vector<128x128xf32> to vector<128x128xbf16>
    %cst_12 = arith.constant dense<0.000000e+00> : vector<8x128xf32>
    %26 = tpu.matmul %23, %25, %cst_12 {dimension_numbers = #tpu.dot_dimension_numbers<[1], [0], [0], [1], [0, 0, 1, 1], [], []>} : vector<8x128xbf16>, vector<128x128xbf16>, vector<8x128xf32> -> vector<8x128xf32>
    %27 = arith.addf %26, %22 : vector<8x128xf32>
    %28 = vector.broadcast %2 : vector<1x128xf32> to vector<8x128xf32>
    %29 = arith.addf %27, %28 : vector<8x128xf32>
    %cst_13 = arith.constant 0.000000e+00 : f32
    %30 = vector.broadcast %cst_13 : f32 to vector<8x128xf32>
    %31 = arith.cmpf ogt, %29, %30 : vector<8x128xf32>
    %cst_14 = arith.constant 0.00999999977 : f32
    %32 = vector.broadcast %cst_14 : f32 to vector<8x128xf32>
    %33 = arith.mulf %32, %29 : vector<8x128xf32>
    %34 = arith.select %31, %29, %33 : vector<8x128xi1>, vector<8x128xf32>
    %35 = arith.truncf %34 : vector<8x128xf32> to vector<8x128xbf16>
    %c0_15 = arith.constant 0 : index
    %c0_16 = arith.constant 0 : index
    %36 = vector.load %arg6[%c0_15, %c0_16] : memref<128x128xf32, #tpu.memory_space<vmem>>, vector<128x128xf32>
    %37 = arith.truncf %36 : vector<128x128xf32> to vector<128x128xbf16>
    %cst_17 = arith.constant dense<0.000000e+00> : vector<8x128xf32>
    %38 = tpu.matmul %35, %37, %cst_17 {dimension_numbers = #tpu.dot_dimension_numbers<[1], [0], [0], [1], [0, 0, 1, 1], [], []>} : vector<8x128xbf16>, vector<128x128xbf16>, vector<8x128xf32> -> vector<8x128xf32>
    %39 = vector.broadcast %3 : vector<1x128xf32> to vector<8x128xf32>
    %40 = arith.addf %38, %39 : vector<8x128xf32>
    %c0_18 = arith.constant 0 : index
    %c0_19 = arith.constant 0 : index
    %41 = vector.load %arg8[%c0_18, %c0_19] : memref<8x128xf32, #tpu.memory_space<vmem>>, vector<8x128xf32>
    tpu.vector_store %arg8[%c0_18, %c0_19], %40 {strides = array<i32>} : memref<8x128xf32, #tpu.memory_space<vmem>>, vector<8x128xf32>,
    %42 = vector.broadcast %4 : vector<1x128xf32> to vector<8x128xf32>
    %43 = arith.mulf %40, %42 : vector<8x128xf32>
    %cst_20 = arith.constant dense<0.000000e+00> : vector<8xf32>
    %44 = vector.multi_reduction <add>, %43, %cst_20 [1] : vector<8x128xf32> to vector<8xf32>
    %45 = vector.shape_cast %44 : vector<8xf32> to vector<8x1xf32>
    %46 = vector.broadcast %5 : vector<1x1xf32> to vector<8x1xf32>
    %47 = arith.addf %45, %46 : vector<8x1xf32>
    %c0_21 = arith.constant 0 : index
    %c0_22 = arith.constant 0 : index
    %48 = vector.load %arg9[%c0_21, %c0_22] : memref<8x1xf32, #tpu.memory_space<vmem>>, vector<8x1xf32>
    tpu.vector_store %arg9[%c0_21, %c0_22], %47 {strides = array<i32>} : memref<8x1xf32, #tpu.memory_space<vmem>>, vector<8x1xf32>,
    return
  }
  func.func @transform_0(%arg0: i32) -> (i32, i32) {
    %c0_i32 = arith.constant 0 : i32
    %c0_i32_0 = arith.constant 0 : i32
    return %arg0, %c0_i32 : i32, i32
  }
  func.func @transform_1(%arg0: i32) -> (i32, i32) {
    %c0_i32 = arith.constant 0 : i32
    %c0_i32_0 = arith.constant 0 : i32
    return %arg0, %c0_i32 : i32, i32
  }
  func.func @transform_2(%arg0: i32) -> (i32, i32) {
    %c0_i32 = arith.constant 0 : i32
    %c0_i32_0 = arith.constant 0 : i32
    %c0_i32_1 = arith.constant 0 : i32
    return %c0_i32, %c0_i32_0 : i32, i32
  }
  func.func @transform_3(%arg0: i32) -> (i32, i32) {
    %c0_i32 = arith.constant 0 : i32
    %c0_i32_0 = arith.constant 0 : i32
    %c0_i32_1 = arith.constant 0 : i32
    return %c0_i32, %c0_i32_0 : i32, i32
  }
  func.func @transform_4(%arg0: i32) -> (i32, i32) {
    %c0_i32 = arith.constant 0 : i32
    %c0_i32_0 = arith.constant 0 : i32
    %c0_i32_1 = arith.constant 0 : i32
    return %c0_i32, %c0_i32_0 : i32, i32
  }
  func.func @transform_5(%arg0: i32) -> (i32, i32) {
    %c0_i32 = arith.constant 0 : i32
    %c0_i32_0 = arith.constant 0 : i32
    %c0_i32_1 = arith.constant 0 : i32
    return %c0_i32, %c0_i32_0 : i32, i32
  }
  func.func @transform_6(%arg0: i32) -> (i32, i32) {
    %c0_i32 = arith.constant 0 : i32
    %c0_i32_0 = arith.constant 0 : i32
    %c0_i32_1 = arith.constant 0 : i32
    return %c0_i32, %c0_i32_0 : i32, i32
  }
  func.func @transform_7(%arg0: i32) -> (i32, i32) {
    %c0_i32 = arith.constant 0 : i32
    %c0_i32_0 = arith.constant 0 : i32
    return %arg0, %c0_i32 : i32, i32
  }
  func.func @transform_8(%arg0: i32) -> (i32, i32) {
    %c0_i32 = arith.constant 0 : i32
    %c0_i32_0 = arith.constant 0 : i32
    return %arg0, %c0_i32 : i32, i32
  }
}

</mosaic_0001>

<bundles_post_ra>
// kernel: muzero_dynamics_forward.1
= control target key start
LH: loop header
LB: loop body
LE: loop exit
PB: predicated region body
PF: predicated region fallthrough
CT: control target
= control target key end

     0   :  { %14 = vsyncpa [#allocation3], 0  ;;  %s783_s0 = inlined_call_operand.vmem [shape: f32[8,256], index: 0, kind: input, shape index: {}]   ;;  %s784_s1 = inlined_call_operand.vmem [shape: s32[8,1], index: 1, kind: input, shape index: {}]   ;;  %s785_s2 = inlined_call_operand.hbm [shape: f32[256,128], index: 2, kind: input, shape index: {}]   ;;  %s786_s3 = inlined_call_operand.hbm [shape: f32[64,128], index: 3, kind: input, shape index: {}]   ;;  %s787_s4 = inlined_call_operand.vmem [shape: f32[128,128], index: 4, kind: input, shape index: {}]   ;;  %s788_s5 = inlined_call_operand.hbm [shape: f32[128,128], index: 5, kind: input, shape index: {}]   ;;  %s789_s6 = inlined_call_operand.vmem [shape: f32[8,128], index: 6, kind: input, shape index: {}]   ;;  %s790_s7 = inlined_call_operand.vmem [shape: f32[8,128], index: 7, kind: output, shape index: {0}]   ;;  %s791_s8 = inlined_call_operand.vmem [shape: f32[8,1], index: 8, kind: output, shape index: {1}]  }
   0x1   :  { %15 = vsyncpa [#allocation5], 0  ;;  %s578_s27 = smov [#allocation4]   ;;  %s579_s29 = smov [#allocation2]  }
   0x2   :  { %s37_s28 = sshll.u32 %s578_s27, 4  ;;  %s25_s30 = sshll.u32 %s579_s29, 4  ;;  %s38_s28 = int_to_ptr.vmem [resolvable:$true] %s37_s28  ;;  %s631_s30 = int_to_ptr.vmem [resolvable:$true] %s25_s30 }
   0x3   :  { %s508_s11 = scalar_lea.hbm %s786_s3, 1024 }
   0x4   :  { %p509_p0 = scmp.ne.s32.totalorder %s786_s3, %s508_s11  ;;  %p512_p1 = scmp.lt.u32.totalorder %s508_s11, %s786_s3 }
   0x6   :  { %p514_p2 = pnand %p512_p1, %p509_p0 }
   0x8   :  { %517 = shalt.err (!%p514_p2)
}
   0x9   :  { %s518_s16 = scalar_lea.vmem %s38_s28, 1024  ;;  %p523_p4 = scmp.lt.s32.totalorder %s38_s28, %s38_s28 }
   0xa   :  { %p519_p3 = scmp.ne.s32.totalorder %s38_s28, %s518_s16  ;;  %p524_p5 = scmp.lt.s32.totalorder %s518_s16, %s518_s16 }
   0xc   :  { %p525_p6 = por %p524_p5, %p523_p4 }
   0xe   :  { %p526_p7 = pnand %p525_p6, %p519_p3 }
  0x10   :  { %529 = shalt.err (!%p526_p7)
}
  0x11   :  { %s580_s17 = smov 128   ;;  %s581_s18 = smov 8  }
  0x12   :  { %43 = dma.hbm_to_vmem [thread:$0]  %s786_s3, 1024, %s38_s28, [#allocation5], %s580_s17, %s580_s17, %s581_s18  }
  0x13   :  { %s530_s23 = scalar_lea.hbm %s785_s2, 4096 }
  0x14   :  { %p531_p8 = scmp.ne.s32.totalorder %s785_s2, %s530_s23  ;;  %p534_p9 = scmp.lt.u32.totalorder %s530_s23, %s785_s2 }
  0x16   :  { %p536_p10 = pnand %p534_p9, %p531_p8 }
  0x18   :  { %539 = shalt.err (!%p536_p10)
}
  0x19   :  { %s540_s29 = scalar_lea.vmem %s631_s30, 4096  ;;  %p545_p12 = scmp.lt.s32.totalorder %s631_s30, %s631_s30 }
  0x1a   :  { %p541_p11 = scmp.ne.s32.totalorder %s631_s30, %s540_s29  ;;  %p546_p13 = scmp.lt.s32.totalorder %s540_s29, %s540_s29 }
  0x1c   :  { %p547_p0 = por %p546_p13, %p545_p12 }
  0x1e   :  { %p548_p1 = pnand %p547_p0, %p541_p11 }
  0x20   :  { %551 = shalt.err (!%p548_p1)
}
  0x21   :  { %31 = dma.hbm_to_vmem [thread:$0]  %s785_s2, 4096, %s631_s30, [#allocation3], %s580_s17, %s580_s17, %s581_s18  }
  0x22   :  { %s582_s9 = smov [#allocation6]   ;;  %s552_s13 = scalar_lea.hbm %s788_s5, 2048 }
  0x23   :  { %s51_s10 = sshll.u32 %s582_s9, 4  ;;  %p553_p2 = scmp.ne.s32.totalorder %s788_s5, %s552_s13  ;;  %s52_s10 = int_to_ptr.vmem [resolvable:$true] %s51_s10 }
  0x24   :  { %p556_p3 = scmp.lt.u32.totalorder %s552_s13, %s788_s5 }
  0x26   :  { %p558_p4 = pnand %p556_p3, %p553_p2 }
  0x28   :  { %561 = shalt.err (!%p558_p4)
}
  0x29   :  { %s562_s20 = scalar_lea.vmem %s52_s10, 2048  ;;  %p567_p6 = scmp.lt.s32.totalorder %s52_s10, %s52_s10 }
  0x2a   :  { %p563_p5 = scmp.ne.s32.totalorder %s52_s10, %s562_s20  ;;  %p568_p7 = scmp.lt.s32.totalorder %s562_s20, %s562_s20 }
  0x2c   :  { %p569_p8 = por %p568_p7, %p567_p6 }
  0x2e   :  { %p570_p9 = pnand %p569_p8, %p563_p5 }
  0x30   :  { %573 = shalt.err (!%p570_p9)
}
  0x31   :  { %57 = dma.hbm_to_vmem [thread:$0]  %s788_s5, 2048, %s52_s10, [#allocation5], %s580_s17, %s580_s17, %s581_s18  }
  0x32   :  { %574 = dma.done.wait [#allocation3], 4096  }
  0x33   :  { %575 = vsyncadd [#allocation3], 4294963200 }
  0x34   :  { %576 = dma.done.wait [#allocation5], 3072  }
  0x35   :  { %577 = vsyncadd [#allocation5], 4294964224  ;;  %v583_v0 = vmov 0   ;;  %v584_v1 = vmov 0.0   ;;  %v91_v2 = vld [vmem:[#allocation2 + $0x80] sm:$0xff]  ;;  %v92_v3 = vld [vmem:[#allocation2 + $0x88] sm:$0xff] }
  0x36   :  { %507 = vset.pattern.permute.xlu0 %v583_v0  ;;  %447 = vmatprep.subr.bf16.mxu1 %v584_v1  ;;  %v75_v4 = vld [vmem:[#allocation2] sm:$0xff]  ;;  %v115_v5 = vpack.c.bf16 %v92_v3, %v91_v2  ;;  %v76_v6 = vld [vmem:[#allocation2 + $0x8] sm:$0xff]  ;;  %v93_v7 = vld [vmem:[#allocation2 + $0x90] sm:$0xff]  ;;  %vm585_vm0 = vmmov 0   ;;  %vm189_vm2 = vcmask 523264   ;;  %vm388_vm4 = vcmask 7168  }
  0x37   :  { %v94_v8 = vld [vmem:[#allocation2 + $0x98] sm:$0xff]  ;;  %v107_v9 = vpack.c.bf16 %v76_v6, %v75_v4  ;;  %v77_v11 = vld [vmem:[#allocation2 + $0x10] sm:$0xff]  ;;  %v95_v13 = vld [vmem:[#allocation2 + $0xa0] sm:$0xff]  ;;  %455 = vmatprep.mubr.msk.bf16.mxu1 %vm585_vm0, %v584_v1  ;;  %v123_v4 = vlaneseq }
  0x38   :  { %v116_v10 = vpack.c.bf16 %v94_v8, %v93_v7  ;;  %v78_v12 = vld [vmem:[#allocation2 + $0x18] sm:$0xff]  ;;  %402 = vmatprep.subr.bf16.mxu0 %v115_v5  ;;  %v96_v14 = vld [vmem:[#allocation2 + $0xa8] sm:$0xff]  ;;  %v79_v17 = vld [vmem:[#allocation2 + $0x20] sm:$0xff] }
  0x39   :  { %403 = vmatpush3.bf16.msra.mxu0 %v107_v9  ;;  %v108_v15 = vpack.c.bf16 %v78_v12, %v77_v11  ;;  %v117_v16 = vpack.c.bf16 %v96_v14, %v95_v13  ;;  %v80_v18 = vld [vmem:[#allocation2 + $0x28] sm:$0xff]  ;;  %v97_v19 = vld [vmem:[#allocation2 + $0xb0] sm:$0xff]  ;;  %v98_v20 = vld [vmem:[#allocation2 + $0xb8] sm:$0xff]  ;;  %v168_v5 = vand.u32 127, %v123_v4 }
  0x3a   :  { %404 = vmatprep.subr.bf16.mxu0 %v116_v10  ;;  %v109_v21 = vpack.c.bf16 %v80_v18, %v79_v17  ;;  %v118_v22 = vpack.c.bf16 %v98_v20, %v97_v19  ;;  %v81_v23 = vld [vmem:[#allocation2 + $0x30] sm:$0xff]  ;;  %v82_v24 = vld [vmem:[#allocation2 + $0x38] sm:$0xff]  ;;  %v99_v25 = vld [vmem:[#allocation2 + $0xc0] sm:$0xff] }
  0x3b   :  { %v100_v26 = vld [vmem:[#allocation2 + $0xc8] sm:$0xff]  ;;  %v169_v29 = vld [vmem:[%s784_s1] sm:$0xff]  ;;  %v110_v31 = vpack.c.bf16 %v82_v24, %v81_v23  ;;  %v179_v33 = vld [vmem:[#allocation4 + $0x10] sm:$0xff] }
  0x3c   :  { %v72_v27 = vld [vmem:[%s783_s0 + $0x8] sm:$0xff]  ;;  %v177_v30 = vld [vmem:[#allocation4] sm:$0xff]  ;;  %171 = vperm.xlu0 %507, %v169_v29   ;;  %v180_v34 = vld [vmem:[#allocation4 + $0x18] sm:$0xff]  ;;  %v119_v35 = vpack.c.bf16 %v100_v26, %v99_v25 }
  0x3d   :  { %405 = vmatpush3.bf16.msra.mxu0 %v108_v15  ;;  %v74_v28 = vpack.c.bf16 %v72_v27, %v72_v27  ;;  %v178_v32 = vld [vmem:[#allocation4 + $0x8] sm:$0xff]  ;;  %v83_v36 = vld [vmem:[#allocation2 + $0x40] sm:$0xff]  ;;  %v101_v39 = vld [vmem:[#allocation2 + $0xd0] sm:$0xff]  ;;  %v186_v41 = vpack.c.bf16 %v180_v34, %v179_v33 }
  0x3e   :  { %406 = vmatprep.subr.bf16.mxu0 %v117_v16  ;;  %v84_v37 = vld [vmem:[#allocation2 + $0x48] sm:$0xff]  ;;  %v185_v38 = vpack.c.bf16 %v178_v32, %v177_v30  ;;  %v102_v40 = vld [vmem:[#allocation2 + $0xd8] sm:$0xff]  ;;  %v181_v43 = vld [vmem:[#allocation4 + $0x20] sm:$0xff] }
  0x3f   :  { %159 = vmatprep.mubr.bf16.mxu0 %v74_v28  ;;  %v111_v42 = vpack.c.bf16 %v84_v37, %v83_v36  ;;  %v182_v44 = vld [vmem:[#allocation4 + $0x28] sm:$0xff]  ;;  %v120_v45 = vpack.c.bf16 %v102_v40, %v101_v39  ;;  %v85_v46 = vld [vmem:[#allocation2 + $0x50] sm:$0xff]  ;;  %v86_v47 = vld [vmem:[#allocation2 + $0x58] sm:$0xff] }
  0x40   :  { %448 = vmatpush3.bf16.msra.mxu1 %v185_v38  ;;  %v103_v48 = vld [vmem:[#allocation2 + $0xe0] sm:$0xff]  ;;  %v104_v49 = vld [vmem:[#allocation2 + $0xe8] sm:$0xff]  ;;  %v187_v50 = vpack.c.bf16 %v182_v44, %v181_v43  ;;  %v112_v51 = vpack.c.bf16 %v86_v47, %v85_v46  ;;  %v183_v52 = vld [vmem:[#allocation4 + $0x30] sm:$0xff] }
  0x41   :  { %407 = vmatpush3.bf16.msra.mxu0 %v109_v21  ;;  %449 = vmatprep.subr.bf16.mxu1 %v584_v1  ;;  %v184_v53 = vld [vmem:[#allocation4 + $0x38] sm:$0xff]  ;;  %v121_v54 = vpack.c.bf16 %v104_v49, %v103_v48  ;;  %v87_v55 = vld [vmem:[#allocation2 + $0x60] sm:$0xff]  ;;  %v88_v56 = vld [vmem:[#allocation2 + $0x68] sm:$0xff] }
  0x42   :  { %408 = vmatprep.subr.bf16.mxu0 %v118_v22  ;;  %v105_v57 = vld [vmem:[#allocation2 + $0xf0] sm:$0xff]  ;;  %v106_v58 = vld [vmem:[#allocation2 + $0xf8] sm:$0xff]  ;;  %v188_v59 = vpack.c.bf16 %v184_v53, %v183_v52  ;;  %v113_v60 = vpack.c.bf16 %v88_v56, %v87_v55  ;;  %v71_v2 = vld [vmem:[%s783_s0] sm:$0xff] }
  0x43   :  { %v122_v61 = vpack.c.bf16 %v106_v58, %v105_v57  ;;  %v89_v62 = vld [vmem:[#allocation2 + $0x70] sm:$0xff]  ;;  %v90_v63 = vld [vmem:[#allocation2 + $0x78] sm:$0xff]  ;;  %v73_v3 = vpack.c.bf16 %v71_v2, %v71_v2  ;;  %v234_v6 = vld [vmem:[%s787_s4] sm:$0xff] }
  0x44   :  { %450 = vmatpush3.bf16.msra.mxu1 %v186_v41  ;;  %v114_v0 = vpack.c.bf16 %v90_v63, %v89_v62  ;;  %v235_v7 = vld [vmem:[%s787_s4 + $0x8] sm:$0xff]  ;;  %v236_v12 = vld [vmem:[%s787_s4 + $0x10] sm:$0xff]  ;;  %v237_v13 = vld [vmem:[%s787_s4 + $0x18] sm:$0xff] }
  0x45   :  { %409 = vmatpush3.bf16.msra.mxu0 %v110_v31  ;;  %451 = vmatprep.subr.bf16.mxu1 %v584_v1  ;;  %v250_v10 = vpack.c.bf16 %v235_v7, %v234_v6  ;;  %v251_v14 = vpack.c.bf16 %v237_v13, %v236_v12  ;;  %v238_v15 = vld [vmem:[%s787_s4 + $0x20] sm:$0xff]  ;;  %v239_v16 = vld [vmem:[%s787_s4 + $0x28] sm:$0xff]  ;;  %v240_v18 = vld [vmem:[%s787_s4 + $0x30] sm:$0xff] }
  0x46   :  { %410 = vmatprep.subr.bf16.mxu0 %v119_v35  ;;  %v252_v17 = vpack.c.bf16 %v239_v16, %v238_v15  ;;  %v241_v19 = vld [vmem:[%s787_s4 + $0x38] sm:$0xff]  ;;  %v242_v21 = vld [vmem:[%s787_s4 + $0x40] sm:$0xff]  ;;  %v243_v22 = vld [vmem:[%s787_s4 + $0x48] sm:$0xff] }
  0x47   :  { %v253_v20 = vpack.c.bf16 %v241_v19, %v240_v18  ;;  %v254_v23 = vpack.c.bf16 %v243_v22, %v242_v21  ;;  %v244_v24 = vld [vmem:[%s787_s4 + $0x50] sm:$0xff]  ;;  %v245_v25 = vld [vmem:[%s787_s4 + $0x58] sm:$0xff]  ;;  %v246_v27 = vld [vmem:[%s787_s4 + $0x60] sm:$0xff] }
  0x48   :  { %452 = vmatpush3.bf16.msra.mxu1 %v187_v50  ;;  %v255_v26 = vpack.c.bf16 %v245_v25, %v244_v24  ;;  %v247_v28 = vld [vmem:[%s787_s4 + $0x68] sm:$0xff]  ;;  %v248_v30 = vld [vmem:[%s787_s4 + $0x70] sm:$0xff]  ;;  %v249_v31 = vld [vmem:[%s787_s4 + $0x78] sm:$0xff] }
  0x49   :  { %411 = vmatpush3.bf16.msra.mxu0 %v111_v42  ;;  %453 = vmatprep.subr.bf16.mxu1 %v584_v1  ;;  %v256_v29 = vpack.c.bf16 %v247_v28, %v246_v27  ;;  %v257_v32 = vpack.c.bf16 %v249_v31, %v248_v30  ;;  %v307_v33 = vld [vmem:[#allocation6] sm:$0xff]  ;;  %v308_v34 = vld [vmem:[#allocation6 + $0x8] sm:$0xff]  ;;  %v309_v35 = vld [vmem:[#allocation6 + $0x10] sm:$0xff]  ;;  %v761_v42 = vshrl.u32 %v123_v4, 7 }
  0x4a   :  { %412 = vmatprep.subr.bf16.mxu0 %v120_v45  ;;  %v323_v36 = vpack.c.bf16 %v308_v34, %v307_v33  ;;  %v310_v37 = vld [vmem:[#allocation6 + $0x18] sm:$0xff]  ;;  %v311_v39 = vld [vmem:[#allocation6 + $0x20] sm:$0xff]  ;;  %v312_v40 = vld [vmem:[#allocation6 + $0x28] sm:$0xff] }
  0x4b   :  { %v324_v38 = vpack.c.bf16 %v310_v37, %v309_v35  ;;  %v325_v41 = vpack.c.bf16 %v312_v40, %v311_v39  ;;  %v313_v43 = vld [vmem:[#allocation6 + $0x30] sm:$0xff]  ;;  %v314_v44 = vld [vmem:[#allocation6 + $0x38] sm:$0xff]  ;;  %v125_v46 = vsub.s32 0, %v761_v42  ;;  %v315_v47 = vld [vmem:[#allocation6 + $0x40] sm:$0xff]  ;;  %v333_v19 = vsub.s32 2, %v761_v42 }
  0x4c   :  { %454 = vmatpush3.bf16.msra.mxu1 %v188_v59  ;;  %v326_v45 = vpack.c.bf16 %v314_v44, %v313_v43  ;;  %v316_v48 = vld [vmem:[#allocation6 + $0x48] sm:$0xff]  ;;  %v70_v49 = vld [vmem:[%s789_s6] sm:$0xff]  ;;  %v317_v53 = vld [vmem:[#allocation6 + $0x50] sm:$0xff] }
  0x4d   :  { %413 = vmatpush3.bf16.msra.mxu0 %v112_v51  ;;  %459 = vmatprep.subr.bf16.mxu1 %v584_v1  ;;  %v327_v50 = vpack.c.bf16 %v316_v48, %v315_v47  ;;  %v126_v52 = vrot.slane %v70_v49, %v125_v46  ;;  %v319_v62 = vld [vmem:[#allocation6 + $0x60] sm:$0xff]  ;;  %v320_v63 = vld [vmem:[#allocation6 + $0x68] sm:$0xff]  ;;  %v321_v2 = vld [vmem:[#allocation6 + $0x70] sm:$0xff]  ;;  %v334_v21 = vrot.slane %v70_v49, %v333_v19 }
  0x4e   :  { %414 = vmatprep.subr.bf16.mxu0 %v121_v54  ;;  %v318_v54 = vld [vmem:[#allocation6 + $0x58] sm:$0xff] }
  0x4f   :  { %v328_v59 = vpack.c.bf16 %v318_v54, %v317_v53 }
  0x51   :  { %415 = vmatpush3.bf16.msra.mxu0 %v113_v60 }
  0x52   :  { %416 = vmatprep.subr.bf16.mxu0 %v122_v61 }
  0x55   :  { %417 = vmatpush3.bf16.msra.mxu0 %v114_v0  ;;  %v329_v0 = vpack.c.bf16 %v320_v63, %v319_v62 }
  0x56   :  { %479 = vmatprep.subr.bf16.mxu0 %v584_v1 }
  0x58   :  { %160 = vmatmul.mubr.bf16.vlgmr.msra.gmra.mrb[0].mxu0 %v73_v3  ;;  %v322_v3 = vld [vmem:[#allocation6 + $0x78] sm:$0xff] }
  0x59   :  { %495 = vmatprep.mubr.msk.bf16.mxu0 %vm585_vm0, %v584_v1  ;;  %480 = vmatpush3.bf16.msra.mxu0 %v323_v36  ;;  %v330_v4 = vpack.c.bf16 %v322_v3, %v321_v2 }
  0x5a   :  { %481 = vmatprep.subr.bf16.mxu0 %v584_v1 }
  0x5d   :  { %482 = vmatpush3.bf16.msra.mxu0 %v324_v38 }
  0x5e   :  { %483 = vmatprep.subr.bf16.mxu0 %v584_v1 }
  0x61   :  { %484 = vmatpush3.bf16.msra.mxu0 %v325_v41 }
  0x62   :  { %485 = vmatprep.subr.bf16.mxu0 %v584_v1 }
  0x65   :  { %486 = vmatpush3.bf16.msra.mxu0 %v326_v45 }
  0x66   :  { %487 = vmatprep.subr.bf16.mxu0 %v584_v1 }
  0x69   :  { %488 = vmatpush3.bf16.msra.mxu0 %v327_v50 }
  0x6a   :  { %489 = vmatprep.subr.bf16.mxu0 %v584_v1 }
  0x6d   :  { %490 = vmatpush3.bf16.msra.mxu0 %v328_v59 }
  0x6e   :  { %491 = vmatprep.subr.bf16.mxu0 %v584_v1 }
  0x71   :  { %492 = vmatpush3.bf16.msra.mxu0 %v329_v0 }
  0x72   :  { %493 = vmatprep.subr.bf16.mxu0 %v584_v1 }
  0x75   :  { %494 = vmatpush3.bf16.msra.mxu0 %v330_v4 }
  0xbb   :  { %v172_v8 = vpop.permute.xlu0 %171 }
  0xbc   :  { %vm173_vm1 = vcmp.eq.s32.totalorder %v168_v5, %v172_v8 }
  0xbd   :  { %v400_v9 = vsel %vm173_vm1, 1.0, %v584_v1 }
  0xbe   :  { %v176_v11 = vpack.c.bf16 %v400_v9, %v400_v9  ;;  %v300_v9 = vsub.s32 1, %v761_v42 }
  0xc0   :  { %456 = vmatmul.mubr.msk.bf16.vlgmr.msra.gmra.mrb[0].mxu1 %vm189_vm2, %v176_v11 }
  0xc1   :  { %460 = vmatpush3.bf16.msra.mxu1 %v250_v10  ;;  %475 = vmatprep.mubr.msk.bf16.mxu1 %vm585_vm0, %v584_v1  ;;  %v301_v10 = vrot.slane %v70_v49, %v300_v9 }
  0xc2   :  { %461 = vmatprep.subr.bf16.mxu1 %v584_v1 }
  0xc5   :  { %462 = vmatpush3.bf16.msra.mxu1 %v251_v14 }
  0xc6   :  { %463 = vmatprep.subr.bf16.mxu1 %v584_v1 }
  0xc9   :  { %464 = vmatpush3.bf16.msra.mxu1 %v252_v17 }
  0xca   :  { %465 = vmatprep.subr.bf16.mxu1 %v584_v1 }
  0xcd   :  { %466 = vmatpush3.bf16.msra.mxu1 %v253_v20  ;;  %v378_v20 = vsub.s32 3, %v761_v42 }
  0xce   :  { %467 = vmatprep.subr.bf16.mxu1 %v584_v1 }
  0xcf   :  { %v379_v22 = vrot.slane %v70_v49, %v378_v20 }
  0xd1   :  { %468 = vmatpush3.bf16.msra.mxu1 %v254_v23 }
  0xd2   :  { %469 = vmatprep.subr.bf16.mxu1 %v584_v1 }
  0xd5   :  { %470 = vmatpush3.bf16.msra.mxu1 %v255_v26 }
  0xd6   :  { %471 = vmatprep.subr.bf16.mxu1 %v584_v1 }
  0xd9   :  { %472 = vmatpush3.bf16.msra.mxu1 %v256_v29  ;;  %v385_v29 = vsub.s32 4, %v761_v42 }
  0xda   :  { %473 = vmatprep.subr.bf16.mxu1 %v584_v1 }
  0xdb   :  { %v386_v30 = vrot.slane %v70_v49, %v385_v29 }
  0xdd   :  { %474 = vmatpush3.bf16.msra.mxu1 %v257_v32 }
 0x12b   :  { %v418_v51 = vpop.f32.mrb[0].mxu0 }
 0x12c   :  { %v419_v55 = vpop.f32.mrb[1].mxu0 }
 0x12d   :  { %v420_v56 = vadd.f32 %v419_v55, %v418_v51  ;;  %v421_v57 = vpop.f32.mrb[2].mxu0 }
 0x12e   :  { %v422_v58 = vpop.f32.mrb[3].mxu0 }
 0x12f   :  { %v162_v60 = vadd.f32 %v420_v56, %v126_v52 }
 0x131   :  { %v233_v61 = vpack.c.bf16 %v162_v60, %v162_v60 }
 0x133   :  { %476 = vmatmul.mubr.bf16.vlgmr.msra.gmra.mrb[4].mxu1 %v233_v61 }
 0x193   :  { %v227_v5 = vpop.f32.mrb[0].mxu1 }
 0x194   :  { %v457_v6 = vpop.f32.mrb[1].mxu1 }
 0x195   :  { %v230_v7 = vpop.f32.mrb[2].mxu1 }
 0x196   :  { %v458_v8 = vpop.f32.mrb[3].mxu1 }
 0x206   :  { %v292_v11 = vpop.f32.mrb[4].mxu1 }
 0x207   :  { %v293_v12 = vadd.f32 %v292_v11, %v227_v5  ;;  %v477_v13 = vpop.f32.mrb[5].mxu1 }
 0x208   :  { %v295_v14 = vpop.f32.mrb[6].mxu1 }
 0x209   :  { %v302_v15 = vadd.f32 %v301_v10, %v293_v12  ;;  %v478_v16 = vpop.f32.mrb[7].mxu1 }
 0x20b   :  { %vm303_vm3 = vcmp.gt.f32.partialorder %v302_v15, 0.0  ;;  %v304_v17 = vmul.f32 0.01, %v302_v15 }
 0x20d   :  { %v305_v1 = vsel %vm303_vm3, %v302_v15, %v304_v17 }
 0x20e   :  { %v306_v18 = vpack.c.bf16 %v305_v1, %v305_v1 }
 0x210   :  { %496 = vmatmul.mubr.bf16.vlgmr.msra.gmra.mrb[4].mxu0 %v306_v18 }
 0x2e3   :  { %v369_v23 = vpop.f32.mrb[4].mxu0 }
 0x2e4   :  { %v370_v24 = vadd.f32 %v369_v23, %v334_v21  ;;  %v497_v25 = vpop.f32.mrb[5].mxu0 }
 0x2e5   :  { %v372_v26 = vpop.f32.mrb[6].mxu0 }
 0x2e6   :  { %375 = vst [vmem:[%s790_s7] sm:$0xff] %v370_v24  ;;  %v498_v27 = vpop.f32.mrb[7].mxu0  ;;  %v380_v28 = vmul.f32 %v379_v22, %v370_v24 }
 0x2e8   :  { %381 = vadd.xlane.f32.xlu0 %v380_v28 }
 0x375   :  { %v382_v31 = vpop.xlane.xlu0 %381 }
 0x376   :  { %v387_v32 = vadd.f32 %v386_v30, %v382_v31 }
 0x378   :  { %389 = vst.msk [vmem:[%s791_s8] sm:$0xff] %vm388_vm4, %v387_v32 }
 0x379   :  { %398 = vsyncpa [#allocation3], 1 }
 0x37a   :  { %399 = vsyncpa [#allocation5], 1 }

</bundles_post_ra>
